<compile_context>
chip_gen: v6e
topology: v6e:2x2x1
jax: 0.10.0
libtpu: 0.0.40
codegen_flags: <defaults>
</compile_context>

<pallas_src>
import jax
import jax.numpy as jnp
from jax import lax
from jax.experimental import pallas as pl
from jax.experimental.pallas import tpu as pltpu


def _round_up(x, m):
    return (x + m - 1) // m * m


def _cdiv(a, b):
    return -(-a // b)


def _make_mlp_kernel(mm_dtype):
    def mlp_kernel(x_ref, w1_ref, b1_ref, w2_ref, b2_ref, w3_ref, b3_ref,
                   o_ref, acc_ref):
        k = pl.program_id(1)

        @pl.when(k == 0)
        def _():
            acc_ref[...] = jnp.zeros_like(acc_ref)

        # Layer-1 partial product for this K slab; f32 accumulation in VMEM.
        x = x_ref[...].astype(mm_dtype)
        acc_ref[...] += jnp.dot(x, w1_ref[...],
                                preferred_element_type=jnp.float32)

        @pl.when(k == pl.num_programs(1) - 1)
        def _():
            h1 = jnp.maximum(acc_ref[...] + b1_ref[...], 0.0)        # [tb,128] f32
            h2 = jnp.dot(h1.astype(mm_dtype), w2_ref[...],
                         preferred_element_type=jnp.float32) + b2_ref[...]
            h2 = jnp.maximum(h2, 0.0)                                 # [tb, 64] f32
            # Final 64->1 layer as a single NT matmul: w3(1,64) . h2(tb,64)^T
            # -> (1, tb), i.e. the lane-dense output row directly.
            # TODO(synk): confirm in a bundle dump this doesn't lower to a big
            # vxpose of h2; if XLU ever became the long pole at large tb, fall
            # back to a 64-term VPU accumulation over h2's columns.
            row = lax.dot_general(
                w3_ref[...], h2,
                dimension_numbers=(((1,), (1,)), ((), ())),
                preferred_element_type=jnp.float32,
            )                                                         # [1, tb]
            o_ref[...] = jnp.reshape(row + b3_ref[0], o_ref.shape)   # [1,1,tb]

    return mlp_kernel


def _vmem_budget_bytes():
    # ~Half of physical VMEM: ~32 MiB on v7x (64 MiB/TC), ~64 MiB on v5e/v6e.
    try:
        cap = int(pltpu.get_tpu_info().vmem_capacity_bytes)
    except Exception:
        cap = 64 * 1024 * 1024  # conservative (v7x-sized) fallback
    return cap // 2


def mlp_forward(x, params, *, matmul_dtype=jnp.float32,
                target_tile_bytes=2 * 1024 * 1024, max_tb=8192):
    """x: [B, D]. Returns [B, 1] float32."""
    w1, b1, w2, b2, w3, b3 = params
    B, D = x.shape
    H1 = w1.shape[1]  # 128
    H2 = w2.shape[1]  # 64

    mm_dtype = jnp.dtype(matmul_dtype)
    x_itemsize = jnp.dtype(x.dtype).itemsize
    w_itemsize = mm_dtype.itemsize

    # Kernel-friendly layouts: W1/W2 resident (optionally bf16), w3 as a
    # lane-major row, biases as (1, out) rows, b3 as an SMEM scalar (a (1,1)
    # VMEM block would pad to a whole (8,128) tile).
    w1c = w1.astype(mm_dtype)
    w2c = w2.astype(mm_dtype)
    b1r = b1.reshape(1, H1).astype(jnp.float32)
    b2r = b2.reshape(1, H2).astype(jnp.float32)
    w3_row = w3.reshape(1, H2).astype(jnp.float32)
    b3_s = b3.reshape(1).astype(jnp.float32)

    budget = _vmem_budget_bytes()

    # --- Batch tile: stream ~target_tile_bytes of x per grid step. ---
    tb = _round_up(max(target_tile_bytes // max(x_itemsize * D, 1), 1), 128)
    tb = max(128, min(tb, max_tb, _round_up(B, 128)))
    # v7x has 2 TensorCores: keep >= 2 batch tiles whenever the batch allows.
    if B > 128 and _cdiv(B, tb) < 2:
        tb = max(128, _round_up(_cdiv(B, 2), 128))

    # --- K tile: split the layer-1 reduction only when D is big and has a
    # multiple-of-128 divisor (ragged K blocks must never feed the reduction).
    tk = D
    if D > 2048:
        for cand in (2048, 1024, 512, 256, 128):
            if D % cand == 0:
                tk = cand
                break
        # TODO(synk): for huge D with no multiple-of-128 divisor, zero-pad W1's
        # K dim (cheap, weights only) so the tail K block contributes zeros.

    def _vmem_need(tb_):
        x_buf = 2 * tb_ * tk * x_itemsize                   # double-buffered x tile
        x_cast = tb_ * tk * w_itemsize if mm_dtype != x.dtype else 0
        w_buf = 2 * (tk * H1 + H1 * H2) * w_itemsize        # W1/W2 blocks, 2 buffers
        small = 6 * 8 * 128 * 4                             # b1,b2,w3 pad to (8,128), x2
        out_buf = 2 * 8 * tb_ * 4                           # (1,1,tb) pads to 8 sublanes
        acc = tb_ * H1 * 4                                  # layer-1 f32 accumulator
        interm = tb_ * (2 * H1 + H2) * 4                    # h1, h2, temps (slack)
        return x_buf + x_cast + w_buf + small + out_buf + acc + interm

    while tb > 128 and _vmem_need(tb) > budget:
        tb -= 128

    num_tiles = _cdiv(B, tb)
    num_k = D // tk if (tk < D and D % tk == 0) else 1

    need = _vmem_need(tb)
    vmem_limit = int(max(min(2 * need, budget), need + (2 << 20), 16 << 20))

    out3 = pl.pallas_call(
        _make_mlp_kernel(mm_dtype),
        out_shape=jax.ShapeDtypeStruct((num_tiles, 1, tb), jnp.float32),
        grid_spec=pltpu.PrefetchScalarGridSpec(
            num_scalar_prefetch=0,
            grid=(num_tiles, num_k),
            in_specs=[
                pl.BlockSpec((tb, tk), lambda i, k: (i, k)),        # x tile (streamed)
                pl.BlockSpec((tk, H1), lambda i, k: (k, 0)),        # W1 slab (resident)
                pl.BlockSpec((1, H1), lambda i, k: (0, 0)),         # b1
                pl.BlockSpec((H1, H2), lambda i, k: (0, 0)),        # W2
                pl.BlockSpec((1, H2), lambda i, k: (0, 0)),         # b2
                pl.BlockSpec((1, H2), lambda i, k: (0, 0)),         # w3 as a row
                pl.BlockSpec(memory_space=pltpu.MemorySpace.SMEM),  # b3 scalar
            ],
            out_specs=pl.BlockSpec((1, 1, tb), lambda i, k: (i, 0, 0)),  # lane-dense row
            scratch_shapes=[pltpu.VMEM((tb, H1), jnp.float32)],     # layer-1 accumulator
        ),
        compiler_params=pltpu.CompilerParams(
            # Batch tiles shard across TensorCores; K is a reduction.
            # TODO(synk): evaluate pltpu.CORE_PARALLEL on v7x for the batch axis.
            dimension_semantics=("parallel", "arbitrary"),
            vmem_limit_bytes=vmem_limit,
        ),
    )(x, w1c, b1r, w2c, b2r, w3_row, b3_s)

    # Lane-dense tiles -> (num_tiles*tb, 1); drop the ragged tail (garbage rows).
    return out3.reshape(num_tiles * tb, 1)[:B]


def init_params(key, input_dim):
    """Deterministic synthetic parameters with the shapes nn.Linear implies."""
    ks = jax.random.split(key, 6)

    def linear(kw, kb, fan_in, fan_out):
        # torch default-ish: U(-1/sqrt(fan_in), 1/sqrt(fan_in))
        bound = 1.0 / jnp.sqrt(float(fan_in))
        w = jax.random.uniform(kw, (fan_in, fan_out), jnp.float32, -bound, bound)
        b = jax.random.uniform(kb, (1, fan_out), jnp.float32, -bound, bound)
        return w, b

    w1, b1 = linear(ks[0], ks[1], input_dim, 128)
    w2, b2 = linear(ks[2], ks[3], 128, 64)
    w3, b3 = linear(ks[4], ks[5], 64, 1)
    return (w1, b1, w2, b2, w3, b3)


def mlp_reference(x, params):
    w1, b1, w2, b2, w3, b3 = params
    h1 = jnp.maximum(x @ w1 + b1, 0.0)
    h2 = jnp.maximum(h1 @ w2 + b2, 0.0)
    return h2 @ w3 + b3


if __name__ == "__main__":
    key = jax.random.PRNGKey(0)
    kx, kp, kx2 = jax.random.split(key, 3)

    batch, input_dim = 16, 32
    x = jax.random.normal(kx, (batch, input_dim), jnp.float32)
    params = init_params(kp, input_dim)
    ref = mlp_reference(x, params)

    # f32 path (exact match with reference math).
    out = jax.block_until_ready(mlp_forward(x, params))
    assert out.shape == (batch, 1)
    assert jnp.allclose(out, ref, atol=1e-5, rtol=1e-5), float(jnp.max(jnp.abs(out - ref)))

    # Ragged batch spanning multiple batch tiles (no wrapper-side padding of x).
    batch2 = 300
    x2 = jax.random.normal(kx2, (batch2, input_dim), jnp.float32)
    ref2 = mlp_reference(x2, params)
    out2 = jax.block_until_ready(mlp_forward(x2, params))
    assert out2.shape == (batch2, 1)
    assert jnp.allclose(out2, ref2, atol=1e-5, rtol=1e-5), float(jnp.max(jnp.abs(out2 - ref2)))

    # bf16 matmul path (bf16 MXU inputs, f32 accumulation) -> looser tolerance.
    out_bf16 = jax.block_until_ready(mlp_forward(x, params, matmul_dtype=jnp.bfloat16))
    assert out_bf16.shape == (batch, 1)
    assert jnp.allclose(out_bf16, ref, atol=3e-2, rtol=3e-2), float(jnp.max(jnp.abs(out_bf16 - ref)))

    print("KERNEL_OK")
</pallas_src>

<mosaic_0001>
module attributes {stable_mosaic.version = 11 : i64} {
  func.func @mlp_kernel(%arg0: i32, %arg1: i32, %arg2: memref<128x32xf32, #tpu.memory_space<vmem>>, %arg3: memref<32x128xf32, #tpu.memory_space<vmem>>, %arg4: memref<1x128xf32, #tpu.memory_space<vmem>>, %arg5: memref<128x64xf32, #tpu.memory_space<vmem>>, %arg6: memref<1x64xf32, #tpu.memory_space<vmem>>, %arg7: memref<1x64xf32, #tpu.memory_space<vmem>>, %arg8: memref<1xf32, #tpu.memory_space<smem>>, %arg9: memref<1x1x128xf32, #tpu.memory_space<vmem>>, %arg10: memref<128x128xf32, #tpu.memory_space<vmem>>) attributes {dimension_semantics = [#tpu.dimension_semantics<parallel>, #tpu.dimension_semantics<arbitrary>], iteration_bounds = array<i64: 1, 1>, scalar_prefetch = 0 : i64, scratch_operands = 1 : i64, tpu.core_type = #tpu.core_type<tc>, window_params = [{transform_indices = @transform_0, window_bounds = array<i64: 128, 32>}, {transform_indices = @transform_1, window_bounds = array<i64: 32, 128>}, {pipeline_mode = #tpu.pipeline_mode<synchronous>, transform_indices = @transform_2, window_bounds = array<i64: 1, 128>}, {pipeline_mode = #tpu.pipeline_mode<synchronous>, transform_indices = @transform_3, window_bounds = array<i64: 128, 64>}, {pipeline_mode = #tpu.pipeline_mode<synchronous>, transform_indices = @transform_4, window_bounds = array<i64: 1, 64>}, {pipeline_mode = #tpu.pipeline_mode<synchronous>, transform_indices = @transform_5, window_bounds = array<i64: 1, 64>}, {transform_indices = @transform_6, window_bounds = array<i64: 1>}, {transform_indices = @transform_7, window_bounds = array<i64: 1, 1, 128>}]} {
    %c0_i32 = arith.constant 0 : i32
    %0 = arith.cmpi eq, %arg1, %c0_i32 : i32
    %1 = arith.extui %0 : i1 to i32
    %c0_i32_0 = arith.constant 0 : i32
    %2 = arith.cmpi ne, %1, %c0_i32_0 : i32
    scf.if %2 {
      %cst_10 = arith.constant 0.000000e+00 : f32
      %12 = vector.broadcast %cst_10 : f32 to vector<128x128xf32>
      %c0_11 = arith.constant 0 : index
      %c0_12 = arith.constant 0 : index
      %13 = vector.load %arg10[%c0_11, %c0_12] : memref<128x128xf32, #tpu.memory_space<vmem>>, vector<128x128xf32>
      tpu.vector_store %arg10[%c0_11, %c0_12], %12 {strides = array<i32>} : memref<128x128xf32, #tpu.memory_space<vmem>>, vector<128x128xf32>,
    } else {
    }
    %c0 = arith.constant 0 : index
    %c0_1 = arith.constant 0 : index
    %3 = vector.load %arg2[%c0, %c0_1] : memref<128x32xf32, #tpu.memory_space<vmem>>, vector<128x32xf32>
    %c0_2 = arith.constant 0 : index
    %c0_3 = arith.constant 0 : index
    %4 = vector.load %arg10[%c0_2, %c0_3] : memref<128x128xf32, #tpu.memory_space<vmem>>, vector<128x128xf32>
    %c0_4 = arith.constant 0 : index
    %c0_5 = arith.constant 0 : index
    %5 = vector.load %arg3[%c0_4, %c0_5] : memref<32x128xf32, #tpu.memory_space<vmem>>, vector<32x128xf32>
    %cst = arith.constant dense<0.000000e+00> : vector<128x128xf32>
    %6 = tpu.matmul %3, %5, %cst {dimension_numbers = #tpu.dot_dimension_numbers<[1], [0], [0], [1], [0, 0, 1, 1], [], []>} : vector<128x32xf32>, vector<32x128xf32>, vector<128x128xf32> -> vector<128x128xf32>
    %7 = arith.addf %4, %6 : vector<128x128xf32>
    %c0_6 = arith.constant 0 : index
    %c0_7 = arith.constant 0 : index
    %8 = vector.load %arg10[%c0_6, %c0_7] : memref<128x128xf32, #tpu.memory_space<vmem>>, vector<128x128xf32>
    tpu.vector_store %arg10[%c0_6, %c0_7], %7 {strides = array<i32>} : memref<128x128xf32, #tpu.memory_space<vmem>>, vector<128x128xf32>,
    %c0_i32_8 = arith.constant 0 : i32
    %9 = arith.cmpi eq, %arg1, %c0_i32_8 : i32
    %10 = arith.extui %9 : i1 to i32
    %c0_i32_9 = arith.constant 0 : i32
    %11 = arith.cmpi ne, %10, %c0_i32_9 : i32
    scf.if %11 {
      %c0_10 = arith.constant 0 : index
      %c0_11 = arith.constant 0 : index
      %12 = vector.load %arg10[%c0_10, %c0_11] : memref<128x128xf32, #tpu.memory_space<vmem>>, vector<128x128xf32>
      %c0_12 = arith.constant 0 : index
      %c0_13 = arith.constant 0 : index
      %13 = vector.load %arg4[%c0_12, %c0_13] : memref<1x128xf32, #tpu.memory_space<vmem>>, vector<1x128xf32>
      %14 = vector.broadcast %13 : vector<1x128xf32> to vector<128x128xf32>
      %15 = arith.addf %12, %14 : vector<128x128xf32>
      %cst_14 = arith.constant 0.000000e+00 : f32
      %16 = vector.broadcast %cst_14 : f32 to vector<128x128xf32>
      %17 = arith.maximumf %15, %16 : vector<128x128xf32>
      %c0_15 = arith.constant 0 : index
      %c0_16 = arith.constant 0 : index
      %18 = vector.load %arg5[%c0_15, %c0_16] : memref<128x64xf32, #tpu.memory_space<vmem>>, vector<128x64xf32>
      %cst_17 = arith.constant dense<0.000000e+00> : vector<128x64xf32>
      %19 = tpu.matmul %17, %18, %cst_17 {dimension_numbers = #tpu.dot_dimension_numbers<[1], [0], [0], [1], [0, 0, 1, 1], [], []>} : vector<128x128xf32>, vector<128x64xf32>, vector<128x64xf32> -> vector<128x64xf32>
      %c0_18 = arith.constant 0 : index
      %c0_19 = arith.constant 0 : index
      %20 = vector.load %arg6[%c0_18, %c0_19] : memref<1x64xf32, #tpu.memory_space<vmem>>, vector<1x64xf32>
      %21 = vector.broadcast %20 : vector<1x64xf32> to vector<128x64xf32>
      %22 = arith.addf %19, %21 : vector<128x64xf32>
      %cst_20 = arith.constant 0.000000e+00 : f32
      %23 = vector.broadcast %cst_20 : f32 to vector<128x64xf32>
      %24 = arith.maximumf %22, %23 : vector<128x64xf32>
      %c0_21 = arith.constant 0 : index
      %c0_22 = arith.constant 0 : index
      %25 = vector.load %arg7[%c0_21, %c0_22] : memref<1x64xf32, #tpu.memory_space<vmem>>, vector<1x64xf32>
      %cst_23 = arith.constant dense<0.000000e+00> : vector<1x128xf32>
      %26 = tpu.matmul %25, %24, %cst_23 {dimension_numbers = #tpu.dot_dimension_numbers<[1], [1], [0], [0], [0, 0, 1, 0], [], []>} : vector<1x64xf32>, vector<128x64xf32>, vector<1x128xf32> -> vector<1x128xf32>
      %c0_24 = arith.constant 0 : index
      %27 = memref.load %arg8[%c0_24] : memref<1xf32, #tpu.memory_space<smem>>
      %28 = vector.broadcast %27 : f32 to vector<1x128xf32>
      %29 = arith.addf %26, %28 : vector<1x128xf32>
      %30 = vector.shape_cast %29 : vector<1x128xf32> to vector<1x1x128xf32>
      %c0_25 = arith.constant 0 : index
      %c0_26 = arith.constant 0 : index
      %c0_27 = arith.constant 0 : index
      %31 = vector.load %arg9[%c0_25, %c0_26, %c0_27] : memref<1x1x128xf32, #tpu.memory_space<vmem>>, vector<1x1x128xf32>
      tpu.vector_store %arg9[%c0_25, %c0_26, %c0_27], %30 {strides = array<i32>} : memref<1x1x128xf32, #tpu.memory_space<vmem>>, vector<1x1x128xf32>,
    } else {
    }
    return
  }
  func.func @transform_0(%arg0: i32, %arg1: i32) -> (i32, i32) {
    %c0_i32 = arith.constant 0 : i32
    return %arg0, %arg1 : i32, i32
  }
  func.func @transform_1(%arg0: i32, %arg1: i32) -> (i32, i32) {
    %c0_i32 = arith.constant 0 : i32
    %c0_i32_0 = arith.constant 0 : i32
    return %arg1, %c0_i32 : i32, i32
  }
  func.func @transform_2(%arg0: i32, %arg1: i32) -> (i32, i32) {
    %c0_i32 = arith.constant 0 : i32
    %c0_i32_0 = arith.constant 0 : i32
    %c0_i32_1 = arith.constant 0 : i32
    return %c0_i32, %c0_i32_0 : i32, i32
  }
  func.func @transform_3(%arg0: i32, %arg1: i32) -> (i32, i32) {
    %c0_i32 = arith.constant 0 : i32
    %c0_i32_0 = arith.constant 0 : i32
    %c0_i32_1 = arith.constant 0 : i32
    return %c0_i32, %c0_i32_0 : i32, i32
  }
  func.func @transform_4(%arg0: i32, %arg1: i32) -> (i32, i32) {
    %c0_i32 = arith.constant 0 : i32
    %c0_i32_0 = arith.constant 0 : i32
    %c0_i32_1 = arith.constant 0 : i32
    return %c0_i32, %c0_i32_0 : i32, i32
  }
  func.func @transform_5(%arg0: i32, %arg1: i32) -> (i32, i32) {
    %c0_i32 = arith.constant 0 : i32
    %c0_i32_0 = arith.constant 0 : i32
    %c0_i32_1 = arith.constant 0 : i32
    return %c0_i32, %c0_i32_0 : i32, i32
  }
  func.func @transform_6(%arg0: i32, %arg1: i32) -> i32 {
    %c0_i32 = arith.constant 0 : i32
    %c0_i32_0 = arith.constant 0 : i32
    return %c0_i32 : i32
  }
  func.func @transform_7(%arg0: i32, %arg1: i32) -> (i32, i32, i32) {
    %c0_i32 = arith.constant 0 : i32
    %c0_i32_0 = arith.constant 0 : i32
    %c0_i32_1 = arith.constant 0 : i32
    return %arg0, %c0_i32, %c0_i32_0 : i32, i32, i32
  }
}

</mosaic_0001>

<bundles_post_ra>
// kernel: tpu_custom_call.1
= control target key start
LH: loop header
LB: loop body
LE: loop exit
PB: predicated region body
PF: predicated region fallthrough
CT: control target
= control target key end

     0   :  { %vm84_vm0 = vcmask 261120   ;;  %s1169_s0 = inlined_call_operand.vmem [shape: f32[16,32], index: 0, kind: input, shape index: {}]   ;;  %s1170_s1 = inlined_call_operand.vmem [shape: f32[32,128], index: 1, kind: input, shape index: {}]   ;;  %s1171_s2 = inlined_call_operand.vmem [shape: f32[1,128], index: 2, kind: input, shape index: {}]   ;;  %s1172_s3 = inlined_call_operand.vmem [shape: f32[128,64], index: 3, kind: input, shape index: {}]   ;;  %s1173_s4 = inlined_call_operand.vmem [shape: f32[1,64], index: 4, kind: input, shape index: {}]   ;;  %s1174_s5 = inlined_call_operand.vmem [shape: f32[1,64], index: 5, kind: input, shape index: {}]   ;;  %s1175_s6 = inlined_call_operand.<no memory space> [shape: f32[1], index: 6, kind: input, shape index: {}]   ;;  %s1176_s7 = inlined_call_operand.hbm [shape: f32[1,1,128], index: 7, kind: output, shape index: {}]  }
   0x1   :  { %v83_v0 = vld [vmem:[%s1170_s1 + $0x18] sm:$0xff]  ;;  %v82_v1 = vld [vmem:[%s1170_s1 + $0x10] sm:$0xff]  ;;  %v48_v2 = vld [vmem:[%s1169_s0] sm:$0xff] }
   0x2   :  { %796 = vmatprep.subr.mxu1 %v83_v0  ;;  %v81_v3 = vld [vmem:[%s1170_s1 + $0x8] sm:$0xff]  ;;  %804 = vmatprep.mubr.msk.f32.mxu1 %vm84_vm0, %v48_v2  ;;  %v80_v4 = vld [vmem:[%s1170_s1] sm:$0xff]  ;;  %v383_v6 = vld [vmem:[%s1172_s3 + $0x78] sm:$0xff] }
   0x3   :  { %797 = vmatpush3.msra.mxu1 %v83_v0  ;;  %v49_v5 = vld [vmem:[%s1169_s0 + $0x8] sm:$0xff]  ;;  %v50_v7 = vld [vmem:[%s1169_s0 + $0x10] sm:$0xff]  ;;  %v51_v9 = vld [vmem:[%s1169_s0 + $0x18] sm:$0xff] }
   0x4   :  { %798 = vmatprep.subr.mxu1 %v82_v1  ;;  %v382_v8 = vld [vmem:[%s1172_s3 + $0x70] sm:$0xff]  ;;  %v381_v10 = vld [vmem:[%s1172_s3 + $0x68] sm:$0xff]  ;;  %v52_v11 = vld [vmem:[%s1169_s0 + $0x20] sm:$0xff] }
   0x5   :  { %799 = vmatpush3.msra.mxu1 %v82_v1 }
   0x6   :  { %800 = vmatprep.subr.mxu1 %v81_v3 }
   0x7   :  { %801 = vmatpush3.msra.mxu1 %v81_v3 }
   0x8   :  { %802 = vmatprep.subr.mxu1 %v80_v4 }
   0x9   :  { %803 = vmatpush3.msra.mxu1 %v80_v4 }
   0xa   :  { %805 = vmatmul.mubr.msk.f32.vlgmr.msra.gmra.mxu1 %vm84_vm0, %v49_v5  ;;  %828 = vmatprep.subr.mxu1 %v383_v6 }
   0xb   :  { %807 = vmatprep.mubr.msk.f32.mxu1 %vm84_vm0, %v50_v7  ;;  %829 = vmatpush3.msra.mxu1 %v383_v6 }
   0xc   :  { %830 = vmatprep.subr.mxu1 %v382_v8 }
   0xd   :  { %13 = vsyncpa [#allocation5], 0  ;;  %831 = vmatpush3.msra.mxu1 %v382_v8  ;;  %v380_v12 = vld [vmem:[%s1172_s3 + $0x60] sm:$0xff]  ;;  %v53_v13 = vld [vmem:[%s1169_s0 + $0x28] sm:$0xff]  ;;  %vm945_vm1 = vmmov 0   ;;  %vm555_vm2 = vcmask 523264  }
   0xe   :  { %808 = vmatmul.mubr.msk.f32.gmra.mxu1 %vm84_vm0, %v51_v9  ;;  %832 = vmatprep.subr.mxu1 %v381_v10  ;;  %v379_v14 = vld [vmem:[%s1172_s3 + $0x58] sm:$0xff]  ;;  %v54_v15 = vld [vmem:[%s1169_s0 + $0x30] sm:$0xff]  ;;  %v377_v18 = vld [vmem:[%s1172_s3 + $0x48] sm:$0xff]  ;;  %s946_s28 = smov [#allocation4]  }
   0xf   :  { %810 = vmatprep.mubr.msk.f32.mxu1 %vm84_vm0, %v52_v11  ;;  %833 = vmatpush3.msra.mxu1 %v381_v10  ;;  %v378_v16 = vld [vmem:[%s1172_s3 + $0x50] sm:$0xff]  ;;  %v55_v17 = vld [vmem:[%s1169_s0 + $0x38] sm:$0xff]  ;;  %v56_v19 = vld [vmem:[%s1169_s0 + $0x40] sm:$0xff]  ;;  %s684_s29 = sshll.u32 %s946_s28, 4  ;;  %s685_s29 = int_to_ptr.vmem [resolvable:$true] %s684_s29 }
  0x10   :  { %834 = vmatprep.subr.mxu1 %v380_v12  ;;  %v376_v20 = vld [vmem:[%s1172_s3 + $0x40] sm:$0xff]  ;;  %v57_v21 = vld [vmem:[%s1169_s0 + $0x48] sm:$0xff]  ;;  %v375_v22 = vld [vmem:[%s1172_s3 + $0x38] sm:$0xff]  ;;  %s922_s30 = scalar_lea.vmem %s685_s29, 16  ;;  %s926_s8 = scalar_lea.vmem %s685_s29, 32 }
  0x11   :  { %835 = vmatpush3.msra.mxu1 %v380_v12  ;;  %v58_v23 = vld [vmem:[%s1169_s0 + $0x50] sm:$0xff]  ;;  %v59_v25 = vld [vmem:[%s1169_s0 + $0x58] sm:$0xff]  ;;  %v373_v26 = vld [vmem:[%s1172_s3 + $0x28] sm:$0xff]  ;;  %p923_p0 = scmp.ne.s32.totalorder %s685_s29, %s922_s30  ;;  %p927_p1 = scmp.lt.s32.totalorder %s685_s29, %s685_s29 }
  0x12   :  { %811 = vmatmul.mubr.msk.f32.gmra.mxu1 %vm84_vm0, %v53_v13  ;;  %836 = vmatprep.subr.mxu1 %v379_v14  ;;  %v374_v24 = vld [vmem:[%s1172_s3 + $0x30] sm:$0xff]  ;;  %v60_v27 = vld [vmem:[%s1169_s0 + $0x60] sm:$0xff]  ;;  %v61_v29 = vld [vmem:[%s1169_s0 + $0x68] sm:$0xff]  ;;  %p928_p2 = scmp.lt.s32.totalorder %s926_s8, %s922_s30 }
  0x13   :  { %813 = vmatprep.mubr.msk.f32.mxu1 %vm84_vm0, %v54_v15  ;;  %837 = vmatpush3.msra.mxu1 %v379_v14  ;;  %v372_v28 = vld [vmem:[%s1172_s3 + $0x20] sm:$0xff]  ;;  %v371_v30 = vld [vmem:[%s1172_s3 + $0x18] sm:$0xff]  ;;  %v62_v31 = vld [vmem:[%s1169_s0 + $0x70] sm:$0xff] }
  0x14   :  { %838 = vmatprep.subr.mxu1 %v378_v16  ;;  %v63_v32 = vld [vmem:[%s1169_s0 + $0x78] sm:$0xff]  ;;  %v370_v33 = vld [vmem:[%s1172_s3 + $0x10] sm:$0xff]  ;;  %v369_v34 = vld [vmem:[%s1172_s3 + $0x8] sm:$0xff]  ;;  %p929_p3 = por %p928_p2, %p927_p1 }
  0x15   :  { %839 = vmatpush3.msra.mxu1 %v378_v16  ;;  %v368_v35 = vld [vmem:[%s1172_s3] sm:$0xff] }
  0x16   :  { %814 = vmatmul.mubr.msk.f32.gmra.mxu1 %vm84_vm0, %v55_v17  ;;  %840 = vmatprep.subr.mxu1 %v377_v18  ;;  %v708_v36 = vld [vmem:[%s1171_s2] ss:$0 sm:$0xff]  ;;  %p930_p4 = pnand %p929_p3, %p923_p0 }
  0x17   :  { %816 = vmatprep.mubr.msk.f32.mxu1 %vm84_vm0, %v56_v19  ;;  %841 = vmatpush3.msra.mxu1 %v377_v18 }
  0x18   :  { %842 = vmatprep.subr.mxu1 %v376_v20 }
  0x19   :  { %843 = vmatpush3.msra.mxu1 %v376_v20 }
  0x1a   :  { %817 = vmatmul.mubr.msk.f32.gmra.mxu1 %vm84_vm0, %v57_v21  ;;  %844 = vmatprep.subr.mxu1 %v375_v22  ;;  %v944_v21 = vmov 0.0  }
  0x1b   :  { %819 = vmatprep.mubr.msk.f32.mxu1 %vm84_vm0, %v58_v23  ;;  %845 = vmatpush3.msra.mxu1 %v375_v22 }
  0x1c   :  { %846 = vmatprep.subr.mxu1 %v374_v24  ;;  %884 = vmatprep.subr.mxu0 %v944_v21 }
  0x1d   :  { %847 = vmatpush3.msra.mxu1 %v374_v24  ;;  %916 = vmatprep.mubr.msk.f32.mxu0 %vm945_vm1, %v944_v21 }
  0x1e   :  { %820 = vmatmul.mubr.msk.f32.gmra.mxu1 %vm84_vm0, %v59_v25  ;;  %848 = vmatprep.subr.mxu1 %v373_v26 }
  0x1f   :  { %822 = vmatprep.mubr.msk.f32.mxu1 %vm84_vm0, %v60_v27  ;;  %849 = vmatpush3.msra.mxu1 %v373_v26 }
  0x20   :  { %850 = vmatprep.subr.mxu1 %v372_v28 }
  0x21   :  { %851 = vmatpush3.msra.mxu1 %v372_v28 }
  0x22   :  { %823 = vmatmul.mubr.msk.f32.gmra.mxu1 %vm84_vm0, %v61_v29  ;;  %852 = vmatprep.subr.mxu1 %v371_v30 }
  0x23   :  { %825 = vmatprep.mubr.msk.f32.mxu1 %vm84_vm0, %v62_v31  ;;  %853 = vmatpush3.msra.mxu1 %v371_v30 }
  0x24   :  { %854 = vmatprep.subr.mxu1 %v370_v33 }
  0x25   :  { %855 = vmatpush3.msra.mxu1 %v370_v33 }
  0x26   :  { %826 = vmatmul.mubr.msk.f32.gmra.mxu1 %vm84_vm0, %v63_v32  ;;  %856 = vmatprep.subr.mxu1 %v369_v34 }
  0x27   :  { %857 = vmatpush3.msra.mxu1 %v369_v34 }
  0x28   :  { %858 = vmatprep.subr.mxu1 %v368_v35 }
  0x29   :  { %859 = vmatpush3.msra.mxu1 %v368_v35 }
  0xca   :  { %v806_v37 = vpop.f32.mrf.mxu1 }
  0xcb   :  { %v337_v38 = vadd.f32 %v806_v37, %v708_v36 }
  0xcc   :  { %v199_v39 = vpop.f32.mrf.mxu1 }
  0xcd   :  { %v336_v40 = vadd.f32 %v708_v36, %v199_v39  ;;  %v353_v43 = vmax.f32 %v337_v38, 0.0 }
  0xce   :  { %v809_v41 = vpop.f32.mrf.mxu1 }
  0xcf   :  { %v352_v42 = vmax.f32 %v336_v40, 0.0  ;;  %v339_v44 = vadd.f32 %v809_v41, %v708_v36 }
  0xd0   :  { %v209_v45 = vpop.f32.mrf.mxu1 }
  0xd1   :  { %v338_v46 = vadd.f32 %v708_v36, %v209_v45  ;;  %860 = vmatprep.mubr.f32.mxu1 %v352_v42  ;;  %v355_v49 = vmax.f32 %v339_v44, 0.0 }
  0xd2   :  { %v812_v47 = vpop.f32.mrf.mxu1  ;;  %861 = vmatmul.mubr.f32.vlgmr.msra.gmra.mxu1 %v353_v43 }
  0xd3   :  { %v354_v48 = vmax.f32 %v338_v46, 0.0  ;;  %v341_v50 = vadd.f32 %v812_v47, %v708_v36 }
  0xd4   :  { %v219_v51 = vpop.f32.mrf.mxu1 }
  0xd5   :  { %v340_v52 = vadd.f32 %v708_v36, %v219_v51  ;;  %863 = vmatprep.mubr.f32.mxu1 %v354_v48  ;;  %v357_v55 = vmax.f32 %v341_v50, 0.0 }
  0xd6   :  { %v815_v53 = vpop.f32.mrf.mxu1  ;;  %864 = vmatmul.mubr.f32.gmra.mxu1 %v355_v49 }
  0xd7   :  { %v356_v54 = vmax.f32 %v340_v52, 0.0  ;;  %v343_v56 = vadd.f32 %v815_v53, %v708_v36 }
  0xd8   :  { %v229_v57 = vpop.f32.mrf.mxu1 }
  0xd9   :  { %v342_v58 = vadd.f32 %v708_v36, %v229_v57  ;;  %866 = vmatprep.mubr.f32.mxu1 %v356_v54  ;;  %v359_v61 = vmax.f32 %v343_v56, 0.0 }
  0xda   :  { %v818_v59 = vpop.f32.mrf.mxu1  ;;  %867 = vmatmul.mubr.f32.gmra.mxu1 %v357_v55 }
  0xdb   :  { %v358_v60 = vmax.f32 %v342_v58, 0.0  ;;  %v345_v62 = vadd.f32 %v818_v59, %v708_v36 }
  0xdc   :  { %v239_v63 = vpop.f32.mrf.mxu1 }
  0xdd   :  { %v344_v0 = vadd.f32 %v708_v36, %v239_v63  ;;  %869 = vmatprep.mubr.f32.mxu1 %v358_v60  ;;  %v361_v3 = vmax.f32 %v345_v62, 0.0 }
  0xde   :  { %v821_v1 = vpop.f32.mrf.mxu1  ;;  %870 = vmatmul.mubr.f32.gmra.mxu1 %v359_v61 }
  0xdf   :  { %v360_v2 = vmax.f32 %v344_v0, 0.0  ;;  %v347_v4 = vadd.f32 %v821_v1, %v708_v36 }
  0xe0   :  { %v249_v5 = vpop.f32.mrf.mxu1 }
  0xe1   :  { %v346_v6 = vadd.f32 %v708_v36, %v249_v5  ;;  %872 = vmatprep.mubr.f32.mxu1 %v360_v2  ;;  %v363_v9 = vmax.f32 %v347_v4, 0.0 }
  0xe2   :  { %v824_v7 = vpop.f32.mrf.mxu1  ;;  %873 = vmatmul.mubr.f32.gmra.mxu1 %v361_v3 }
  0xe3   :  { %v362_v8 = vmax.f32 %v346_v6, 0.0  ;;  %v349_v10 = vadd.f32 %v824_v7, %v708_v36  ;;  %v552_v7 = vld [vmem:[%s1174_s5] sm:$0x1] }
  0xe4   :  { %v259_v11 = vpop.f32.mrf.mxu1 }
  0xe5   :  { %v348_v12 = vadd.f32 %v708_v36, %v259_v11  ;;  %875 = vmatprep.mubr.f32.mxu1 %v362_v8  ;;  %v365_v15 = vmax.f32 %v349_v10, 0.0  ;;  %v554_v8 = vstv %s1175_s6 }
  0xe6   :  { %v827_v13 = vpop.f32.mrf.mxu1  ;;  %876 = vmatmul.mubr.f32.gmra.mxu1 %v363_v9 }
  0xe7   :  { %v364_v14 = vmax.f32 %v348_v12, 0.0  ;;  %v351_v16 = vadd.f32 %v827_v13, %v708_v36 }
  0xe8   :  { %v269_v17 = vpop.f32.mrf.mxu1 }
  0xe9   :  { %v350_v18 = vadd.f32 %v708_v36, %v269_v17  ;;  %878 = vmatprep.mubr.f32.mxu1 %v364_v14  ;;  %v367_v20 = vmax.f32 %v351_v16, 0.0  ;;  %v709_v36 = vld [vmem:[%s1173_s4] ss:$0 sm:$0xff] }
  0xea   :  { %879 = vmatmul.mubr.f32.gmra.mxu1 %v365_v15 }
  0xeb   :  { %v366_v19 = vmax.f32 %v350_v18, 0.0 }
  0xed   :  { %881 = vmatprep.mubr.f32.mxu1 %v366_v19 }
  0xee   :  { %882 = vmatmul.mubr.f32.gmra.mxu1 %v367_v20 }
 0x192   :  { %v1116_v22 = vpop.f32.mrf.mxu1 }
 0x193   :  { %v463_v2 = vadd.f32 %v1116_v22, %v709_v36 }
 0x194   :  { %v1118_v23 = vpop.f32.mrf.mxu1 }
 0x195   :  { %v537_v4 = vmax.f32 %v463_v2, 0.0  ;;  %v458_v5 = vadd.f32 %v709_v36, %v1118_v23 }
 0x196   :  { %v865_v24 = vpop.f32.mrf.mxu1 }
 0x197   :  { %v473_v62 = vadd.f32 %v865_v24, %v709_v36  ;;  %v536_v6 = vmax.f32 %v458_v5, 0.0 }
 0x198   :  { %v1120_v25 = vpop.f32.mrf.mxu1 }
 0x199   :  { %v539_v0 = vmax.f32 %v473_v62, 0.0  ;;  %v468_v1 = vadd.f32 %v709_v36, %v1120_v25 }
 0x19a   :  { %v868_v26 = vpop.f32.mrf.mxu1 }
 0x19b   :  { %v483_v58 = vadd.f32 %v868_v26, %v709_v36  ;;  %v538_v3 = vmax.f32 %v468_v1, 0.0 }
 0x19c   :  { %v477_v27 = vpop.f32.mrf.mxu1 }
 0x19d   :  { %v541_v60 = vmax.f32 %v483_v58, 0.0  ;;  %v478_v61 = vadd.f32 %v709_v36, %v477_v27 }
 0x19e   :  { %v871_v28 = vpop.f32.mrf.mxu1 }
 0x19f   :  { %v493_v54 = vadd.f32 %v871_v28, %v709_v36  ;;  %v540_v63 = vmax.f32 %v478_v61, 0.0 }
 0x1a0   :  { %v487_v29 = vpop.f32.mrf.mxu1 }
 0x1a1   :  { %v543_v56 = vmax.f32 %v493_v54, 0.0  ;;  %v488_v57 = vadd.f32 %v709_v36, %v487_v29 }
 0x1a2   :  { %v874_v30 = vpop.f32.mrf.mxu1 }
 0x1a3   :  { %v503_v50 = vadd.f32 %v874_v30, %v709_v36  ;;  %v542_v59 = vmax.f32 %v488_v57, 0.0 }
 0x1a4   :  { %v497_v31 = vpop.f32.mrf.mxu1 }
 0x1a5   :  { %v545_v52 = vmax.f32 %v503_v50, 0.0  ;;  %v498_v53 = vadd.f32 %v709_v36, %v497_v31 }
 0x1a6   :  { %v877_v32 = vpop.f32.mrf.mxu1 }
 0x1a7   :  { %v513_v46 = vadd.f32 %v877_v32, %v709_v36  ;;  %v544_v55 = vmax.f32 %v498_v53, 0.0 }
 0x1a8   :  { %v507_v33 = vpop.f32.mrf.mxu1 }
 0x1a9   :  { %v547_v48 = vmax.f32 %v513_v46, 0.0  ;;  %v508_v49 = vadd.f32 %v709_v36, %v507_v33 }
 0x1aa   :  { %v880_v34 = vpop.f32.mrf.mxu1 }
 0x1ab   :  { %v523_v42 = vadd.f32 %v880_v34, %v709_v36  ;;  %v546_v51 = vmax.f32 %v508_v49, 0.0 }
 0x1ac   :  { %v517_v35 = vpop.f32.mrf.mxu1 }
 0x1ad   :  { %v549_v44 = vmax.f32 %v523_v42, 0.0  ;;  %v518_v45 = vadd.f32 %v709_v36, %v517_v35 }
 0x1ae   :  { %v883_v37 = vpop.f32.mrf.mxu1 }
 0x1af   :  { %v533_v38 = vadd.f32 %v883_v37, %v709_v36  ;;  %v548_v47 = vmax.f32 %v518_v45, 0.0 }
 0x1b0   :  { %v527_v39 = vpop.f32.mrf.mxu1 }
 0x1b1   :  { %v551_v40 = vmax.f32 %v533_v38, 0.0  ;;  %v528_v41 = vadd.f32 %v709_v36, %v527_v39 }
 0x1b3   :  { %885 = vmatpush3.xpose.msk.msra.mxu0 %vm555_vm2, %v551_v40  ;;  %v550_v43 = vmax.f32 %v528_v41, 0.0 }
 0x1b4   :  { %886 = vmatprep.subr.mxu0 %v944_v21 }
 0x1b7   :  { %887 = vmatpush3.xpose.msk.msra.mxu0 %vm555_vm2, %v550_v43 }
 0x1b8   :  { %888 = vmatprep.subr.mxu0 %v944_v21 }
 0x1bb   :  { %889 = vmatpush3.xpose.msk.msra.mxu0 %vm555_vm2, %v549_v44 }
 0x1bc   :  { %890 = vmatprep.subr.mxu0 %v944_v21 }
 0x1bf   :  { %891 = vmatpush3.xpose.msk.msra.mxu0 %vm555_vm2, %v548_v47 }
 0x1c0   :  { %892 = vmatprep.subr.mxu0 %v944_v21 }
 0x1c3   :  { %893 = vmatpush3.xpose.msk.msra.mxu0 %vm555_vm2, %v547_v48 }
 0x1c4   :  { %894 = vmatprep.subr.mxu0 %v944_v21 }
 0x1c7   :  { %895 = vmatpush3.xpose.msk.msra.mxu0 %vm555_vm2, %v546_v51 }
 0x1c8   :  { %896 = vmatprep.subr.mxu0 %v944_v21 }
 0x1cb   :  { %897 = vmatpush3.xpose.msk.msra.mxu0 %vm555_vm2, %v545_v52 }
 0x1cc   :  { %898 = vmatprep.subr.mxu0 %v944_v21 }
 0x1cf   :  { %899 = vmatpush3.xpose.msk.msra.mxu0 %vm555_vm2, %v544_v55 }
 0x1d0   :  { %900 = vmatprep.subr.mxu0 %v944_v21 }
 0x1d3   :  { %901 = vmatpush3.xpose.msk.msra.mxu0 %vm555_vm2, %v543_v56 }
 0x1d4   :  { %902 = vmatprep.subr.mxu0 %v944_v21 }
 0x1d7   :  { %903 = vmatpush3.xpose.msk.msra.mxu0 %vm555_vm2, %v542_v59 }
 0x1d8   :  { %904 = vmatprep.subr.mxu0 %v944_v21 }
 0x1db   :  { %905 = vmatpush3.xpose.msk.msra.mxu0 %vm555_vm2, %v541_v60 }
 0x1dc   :  { %906 = vmatprep.subr.mxu0 %v944_v21 }
 0x1df   :  { %907 = vmatpush3.xpose.msk.msra.mxu0 %vm555_vm2, %v540_v63 }
 0x1e0   :  { %908 = vmatprep.subr.mxu0 %v944_v21 }
 0x1e3   :  { %909 = vmatpush3.xpose.msk.msra.mxu0 %vm555_vm2, %v539_v0 }
 0x1e4   :  { %910 = vmatprep.subr.mxu0 %v944_v21 }
 0x1e7   :  { %911 = vmatpush3.xpose.msk.msra.mxu0 %vm555_vm2, %v538_v3 }
 0x1e8   :  { %912 = vmatprep.subr.mxu0 %v944_v21 }
 0x1eb   :  { %913 = vmatpush3.xpose.msk.msra.mxu0 %vm555_vm2, %v537_v4 }
 0x1ec   :  { %914 = vmatprep.subr.mxu0 %v944_v21 }
 0x1ef   :  { %915 = vmatpush3.xpose.msk.msra.mxu0 %vm555_vm2, %v536_v6 }
 0x1f2   :  { %917 = vmatmul.mubr.msk.f32.vlgmr.msra.gmra.mxu0 %vm555_vm2, %v552_v7 }
 0x2b2   :  { %v673_v9 = vpop.f32.mrf.mxu0 }
 0x2b3   :  { %v674_v10 = vadd.f32 %v673_v9, %v554_v8 }
 0x2b4   :  { %v918_v11 = vpop.f32.mrf.mxu0 }
 0x2b5   :  { %677 = vst [vmem:[#allocation4] sm:$0x1] %v674_v10 }
 0x2b6   :  { %933 = shalt.err (!%p930_p4)
}
 0x2b7   :  { %687 = dma.vmem_to_hbm [thread:$0]  %s685_s29, 16, %s1176_s7, [#allocation5]  }
 0x2b8   :  { %942 = dma.done.wait [#allocation5], 16  }
 0x2b9   :  { %943 = vsyncadd [#allocation5], 4294967280 }
 0x2ba   :  { %691 = vsyncpa [#allocation5], 1 }

</bundles_post_ra>
